<compile_context>
chip_gen: v7x
topology: tpu7x:2x2x1
jax: 0.10.0
libtpu: 0.0.40
codegen_flags: <defaults>
</compile_context>

<pallas_src>
import jax
import jax.numpy as jnp
import numpy as np
from jax.experimental import pallas as pl
from jax.experimental.pallas import tpu as pltpu


# ---------------------------------------------------------------------------
# Host-side constant fold of z = softmax(xc, -1) + sigmoid(xc) + softplus(xc).
# xc is a literal in the torch module, so this is a pure compile-time constant.
# ---------------------------------------------------------------------------
def _compute_z_const() -> np.ndarray:
    xc = np.array([[1.0, 1.0], [1.2, 1.0], [3.0, 3.0]], dtype=np.float64)
    e = np.exp(xc - xc.max(axis=-1, keepdims=True))
    softmax = e / e.sum(axis=-1, keepdims=True)
    sigmoid = 1.0 / (1.0 + np.exp(-xc))
    softplus = np.log1p(np.exp(xc))
    return (softmax + sigmoid + softplus).astype(np.float32)  # (3, 2)


_Z = _compute_z_const()                       # (3, 2) constant
_ZC = np.zeros((8, 2), dtype=np.float32)      # z columns, padded to 8 sublanes
_ZC[:3, :] = _Z


# ---------------------------------------------------------------------------
# Kernel: out[s, n] = z[s,0]*W.T[0,n] + z[s,1]*W.T[1,n] + b[n]
#   zc_ref : (8, 2)   f32  — padded columns of the constant z
#   p_ref  : (8, 128) f32  — row 0,1 = weight.T rows; row 2 = bias; rest zero
#   out_ref: (8, 128) f32  — lane-dense result slab (valid region = [:3, :2])
# Pure VPU broadcast-mul-adds; no MXU, no transcendentals, no grid.
# ---------------------------------------------------------------------------
def linear_z_kernel(zc_ref, p_ref, out_ref):
    zc = zc_ref[...]            # (8, 2)
    p = p_ref[...]              # (8, 128)
    out_ref[...] = (zc[:, 0:1] * p[0:1, :]
                    + zc[:, 1:2] * p[1:2, :]
                    + p[2:3, :])


@jax.jit
def model_forward(x1, weight, bias):
    """x1: (1, 3, 2) (unused — dead branch in the torch module),
    weight: (2, 2), bias: (2,).  Returns (1, 3, 2) f32 = linear(z)."""
    del x1  # the module's returned value does not depend on x1

    w = weight.astype(jnp.float32)
    b = bias.astype(jnp.float32)

    # Pack weight.T and bias into one lane-dense (8, 128) parameter slab.
    params = jnp.zeros((8, 128), jnp.float32)
    params = params.at[0:2, 0:2].set(w.T)     # rows 0,1 = weight.T
    params = params.at[2, 0:2].set(b)         # row 2   = bias
    zc = jnp.asarray(_ZC)                     # compile-time constant under jit

    vmem = pltpu.MemorySpace.VMEM
    out_pad = pl.pallas_call(
        linear_z_kernel,
        out_shape=jax.ShapeDtypeStruct((8, 128), jnp.float32),
        in_specs=[pl.BlockSpec(memory_space=vmem),
                  pl.BlockSpec(memory_space=vmem)],
        out_specs=pl.BlockSpec(memory_space=vmem),
        cost_estimate=pl.CostEstimate(flops=4096, transcendentals=0,
                                      bytes_accessed=8 * 128 * 4 * 2 + 8 * 2 * 4),
    )(zc, params)

    return out_pad[:3, :2].reshape(1, 3, 2)


if __name__ == "__main__":
    key = jax.random.PRNGKey(0)
    kx, kw, kb = jax.random.split(key, 3)

    # Deterministic Linear(2, 2) parameters (torch-style uniform(-1/sqrt(in), 1/sqrt(in))).
    bound = 1.0 / float(np.sqrt(2.0))
    weight = jax.random.uniform(kw, (2, 2), jnp.float32, -bound, bound)
    bias = jax.random.uniform(kb, (2,), jnp.float32, -bound, bound)

    # x1 matches the torch module exactly; it does not affect the returned value.
    x1 = jax.random.normal(kx, (1, 3, 2), dtype=jnp.float32)

    out = jax.block_until_ready(model_forward(x1, weight, bias))

    # Pure-JAX reference (the returned value depends only on the constant tensor).
    xc = jnp.array([[1.0, 1.0], [1.2, 1.0], [3.0, 3.0]], dtype=jnp.float32)
    z = jax.nn.softmax(xc, axis=-1) + jax.nn.sigmoid(xc) + jax.nn.softplus(xc)
    ref = (z @ weight.T + bias).reshape(1, 3, 2)

    assert out.shape == (1, 3, 2) and out.dtype == jnp.float32
    assert jnp.allclose(out, ref, atol=1e-5, rtol=1e-5)
    print("KERNEL_OK")
</pallas_src>

<mosaic_0001>
module attributes {stable_mosaic.version = 11 : i64} {
  func.func @linear_z_kernel(%arg0: memref<8x2xf32, #tpu.memory_space<vmem>>, %arg1: memref<8x128xf32, #tpu.memory_space<vmem>>, %arg2: memref<8x128xf32, #tpu.memory_space<vmem>>) attributes {dimension_semantics = [], scalar_prefetch = 0 : i64, scratch_operands = 0 : i64, tpu.core_type = #tpu.core_type<tc>} {
    %c0 = arith.constant 0 : index
    %c0_0 = arith.constant 0 : index
    %0 = vector.load %arg0[%c0, %c0_0] : memref<8x2xf32, #tpu.memory_space<vmem>>, vector<8x2xf32>
    %c0_1 = arith.constant 0 : index
    %c0_2 = arith.constant 0 : index
    %1 = vector.load %arg1[%c0_1, %c0_2] : memref<8x128xf32, #tpu.memory_space<vmem>>, vector<8x128xf32>
    %2 = vector.extract_strided_slice %0 {offsets = [0, 0], sizes = [8, 1], strides = [1, 1]} : vector<8x2xf32> to vector<8x1xf32>
    %3 = vector.extract_strided_slice %1 {offsets = [0, 0], sizes = [1, 128], strides = [1, 1]} : vector<8x128xf32> to vector<1x128xf32>
    %4 = vector.broadcast %2 : vector<8x1xf32> to vector<8x128xf32>
    %5 = vector.broadcast %3 : vector<1x128xf32> to vector<8x128xf32>
    %6 = arith.mulf %4, %5 : vector<8x128xf32>
    %7 = vector.extract_strided_slice %0 {offsets = [0, 1], sizes = [8, 1], strides = [1, 1]} : vector<8x2xf32> to vector<8x1xf32>
    %8 = vector.extract_strided_slice %1 {offsets = [1, 0], sizes = [1, 128], strides = [1, 1]} : vector<8x128xf32> to vector<1x128xf32>
    %9 = vector.broadcast %7 : vector<8x1xf32> to vector<8x128xf32>
    %10 = vector.broadcast %8 : vector<1x128xf32> to vector<8x128xf32>
    %11 = arith.mulf %9, %10 : vector<8x128xf32>
    %12 = arith.addf %6, %11 : vector<8x128xf32>
    %13 = vector.extract_strided_slice %1 {offsets = [2, 0], sizes = [1, 128], strides = [1, 1]} : vector<8x128xf32> to vector<1x128xf32>
    %14 = vector.broadcast %13 : vector<1x128xf32> to vector<8x128xf32>
    %15 = arith.addf %12, %14 : vector<8x128xf32>
    %c0_3 = arith.constant 0 : index
    %c0_4 = arith.constant 0 : index
    %16 = vector.load %arg2[%c0_3, %c0_4] : memref<8x128xf32, #tpu.memory_space<vmem>>, vector<8x128xf32>
    tpu.vector_store %arg2[%c0_3, %c0_4], %15 {strides = array<i32>} : memref<8x128xf32, #tpu.memory_space<vmem>>, vector<8x128xf32>,
    return
  }
}

</mosaic_0001>

<bundles_post_ra>
// kernel: model_forward.1
= control target key start
LH: loop header
LB: loop body
LE: loop exit
PB: predicated region body
PF: predicated region fallthrough
CT: control target
= control target key end

     0   :  { %v47_v0 = vmov 0   ;;  %v48_v2 = vmov 1   ;;  %v18_v3 = vlaneseq  ;;  %s73_s0 = inlined_call_operand.vmem [shape: f32[8,2], index: 0, kind: input, shape index: {}]   ;;  %s74_s1 = inlined_call_operand.vmem [shape: f32[8,128], index: 1, kind: input, shape index: {}]   ;;  %s75_s2 = inlined_call_operand.vmem [shape: f32[8,128], index: 2, kind: output, shape index: {}]  }
   0x1   :  { %45 = vset.pattern.permute.xlu0 %v47_v0  ;;  %v11_v1 = vld [vmem:[%s73_s0] sm:$0xff] }
   0x2   :  { %15 = vperm.xlu0 %45, %v11_v1   ;;  %v19_v4 = vshrl.u32 %v18_v3, 7  ;;  %v12_v7 = vld [vmem:[%s74_s1] sm:$0xff] }
   0x4   :  { %v20_v5 = vsub.s32 0, %v19_v4  ;;  %v29_v6 = vsub.s32 1, %v19_v4  ;;  %v35_v11 = vsub.s32 2, %v19_v4 }
   0x6   :  { %46 = vset.pattern.permute.xlu0 %v48_v2  ;;  %v21_v9 = vrot.slane %v12_v7, %v20_v5  ;;  %v30_v10 = vrot.slane %v12_v7, %v29_v6  ;;  %v36_v14 = vrot.slane %v12_v7, %v35_v11 }
   0x7   :  { %24 = vperm.xlu0 %46, %v11_v1  }
  0x81   :  { %v16_v8 = vpop.permute.xlu0 %15 }
  0x82   :  { %v22_v13 = vmul.f32 %v21_v9, %v16_v8 }
  0x86   :  { %v25_v12 = vpop.permute.xlu0 %24 }
  0x87   :  { %v31_v15 = vmul.f32 %v30_v10, %v25_v12 }
  0x89   :  { %v32_v16 = vadd.f32 %v31_v15, %v22_v13 }
  0x8b   :  { %v37_v17 = vadd.f32 %v36_v14, %v32_v16 }
  0x8d   :  { %38 = vst [vmem:[%s75_s2] sm:$0xff] %v37_v17 }

</bundles_post_ra>
